<compile_context>
chip_gen: v6e
topology: v6e:2x2x1
jax: 0.10.0
libtpu: 0.0.40
codegen_flags: <defaults>
</compile_context>

<pallas_src>
import functools

import numpy as np
import jax
import jax.numpy as jnp
from jax.experimental import pallas as pl
from jax.experimental.pallas import tpu as pltpu


# ------------------------------------------------------------------ kernel ---

def _bilstm_kernel(mask_ref, gx_ref, whh_ref, y_ref, hf_ref, *, T, H):
    """One grid step = one LSTM direction (0 = forward, 1 = reverse).

    Refs (blocks):
      mask_ref : (T, B, 1)  f32   1.0 where t < len[b], else 0.0
      gx_ref   : (T, B, 4H) f32   precomputed x_t @ W_ih + (b_ih + b_hh)
      whh_ref  : (H, 4H)    f32   recurrent weight of this direction
      y_ref    : (T, B, H)  f32   per-step hidden output of this direction
      hf_ref   : (B, H)     f32   final hidden state of this direction
    """
    d = pl.program_id(0)                    # 0 = forward, 1 = reverse
    B = y_ref.shape[1]
    W = whh_ref[...]                        # (H, 4H) — loaded once, loop-invariant

    def step(s, carry):
        h_prev, c_prev = carry
        # actual (un-reversed) time index processed at loop step s
        actual_t = jnp.where(d == 0, s, T - 1 - s)

        gx_t = gx_ref[pl.ds(actual_t, 1)][0]        # (B, 4H)
        m = mask_ref[pl.ds(actual_t, 1)][0]         # (B, 1)

        # only the small serial matmul remains in the recurrence
        gates = gx_t + jnp.dot(h_prev, W, preferred_element_type=jnp.float32)

        i = jax.nn.sigmoid(gates[:, 0:H])           # PyTorch gate order i,f,g,o
        f = jax.nn.sigmoid(gates[:, H:2 * H])
        g = jnp.tanh(gates[:, 2 * H:3 * H])
        o = jax.nn.sigmoid(gates[:, 3 * H:4 * H])

        c_new = f * c_prev + i * g
        h_new = o * jnp.tanh(c_new)

        # pack_padded_sequence semantics: padded steps freeze state, emit 0.
        h_next = m * h_new + (1.0 - m) * h_prev
        c_next = m * c_new + (1.0 - m) * c_prev
        y_ref[pl.ds(actual_t, 1)] = (m * h_new)[None]
        return (h_next, c_next)

    h0 = jnp.zeros((B, H), jnp.float32)
    c0 = jnp.zeros((B, H), jnp.float32)
    h_fin, _ = jax.lax.fori_loop(0, T, step, (h0, c0))
    hf_ref[...] = h_fin


def _bilstm_pallas(mask, gx, whh, T, B, H):
    """gx: (2, T, B, 4H), whh: (2, H, 4H), mask: (T, B, 1) -> y (2,T,B,H), h (2,B,H)."""
    y, hf = pl.pallas_call(
        functools.partial(_bilstm_kernel, T=T, H=H),
        out_shape=(jax.ShapeDtypeStruct((2, T, B, H), jnp.float32),
                   jax.ShapeDtypeStruct((2, B, H), jnp.float32)),
        grid=(2,),
        in_specs=[
            pl.BlockSpec((T, B, 1), lambda d: (0, 0, 0)),                 # mask (shared)
            pl.BlockSpec((None, T, B, 4 * H), lambda d: (d, 0, 0, 0)),    # gates_x per dir
            pl.BlockSpec((None, H, 4 * H), lambda d: (d, 0, 0)),          # W_hh per dir
        ],
        out_specs=(
            pl.BlockSpec((None, T, B, H), lambda d: (d, 0, 0, 0)),        # y per dir
            pl.BlockSpec((None, B, H), lambda d: (d, 0, 0)),              # final h per dir
        ),
        compiler_params=pltpu.CompilerParams(
            # the two directions are fully independent -> one per TensorCore on v7x
            dimension_semantics=("parallel",)),
    )(mask, gx, whh)
    return y, hf


# ---------------------------------------------------------------- module -----

def init_params(key, input_size, hidden_size):
    """Deterministic init mimicking nn.LSTM: U(-1/sqrt(H), 1/sqrt(H))."""
    stdv = 1.0 / jnp.sqrt(hidden_size)
    ks = jax.random.split(key, 8)

    def u(k, shape):
        return jax.random.uniform(k, shape, jnp.float32, -stdv, stdv)

    H4 = 4 * hidden_size
    params = {}
    for d, off in (("f", 0), ("r", 4)):
        w_ih = u(ks[off + 0], (H4, input_size))     # PyTorch stores (4H, D)
        w_hh = u(ks[off + 1], (H4, hidden_size))    # (4H, H)
        b_ih = u(ks[off + 2], (H4,))
        b_hh = u(ks[off + 3], (H4,))
        params[f"w_ih_{d}"] = w_ih.T                # kernel uses (D, 4H)
        params[f"w_hh_{d}"] = w_hh.T                # kernel uses (H, 4H)
        params[f"b_{d}"] = (b_ih + b_hh)[None, :]   # (1, 4H)
    return params


def rnn_default_forward(params, x_btd, lens):
    """Equivalent of RNN_default.forward(x, lens) -> (x, lens, h).

    `lens` is host-side (list / np.ndarray) so t_max needs no device sync.
    """
    lens_np = np.asarray(lens, np.int32)
    t_max = int(lens_np.max())                     # pad_packed_sequence length (host)

    B, T, D = x_btd.shape
    H = params["w_hh_f"].shape[0]

    # pad batch to the f32 sublane count (8) so vregs / MXU rows aren't wasted
    B_pad = max(8, ((B + 7) // 8) * 8)
    x = jnp.zeros((B_pad, T, D), jnp.float32).at[:B].set(x_btd.astype(jnp.float32))
    lens_dev = jnp.zeros((B_pad,), jnp.int32).at[:B].set(jnp.asarray(lens_np))

    # ---- hoisted time-parallel input projection, both directions at once ----
    w_ih = jnp.stack([params["w_ih_f"], params["w_ih_r"]], axis=0)     # (2, D, 4H)
    b = jnp.stack([params["b_f"], params["b_r"]], axis=0)              # (2, 1, 4H)
    gx = jnp.einsum("btd,kdg->ktbg", x, w_ih) + b[:, :, None, :]       # (2, T, B_pad, 4H)

    whh = jnp.stack([params["w_hh_f"], params["w_hh_r"]], axis=0)      # (2, H, 4H)

    # validity mask: 1.0 where t < len[b]  (padded batch rows have len 0)
    mask = (jnp.arange(T, dtype=jnp.int32)[:, None] < lens_dev[None, :]
            ).astype(jnp.float32)[:, :, None]                          # (T, B_pad, 1)

    y, hf = _bilstm_pallas(mask, gx, whh, T, B_pad, H)                 # (2,T,B_pad,H), (2,B_pad,H)

    y_out = jnp.concatenate([y[0], y[1]], axis=-1)                     # (T, B_pad, 2H)
    y_out = jnp.transpose(y_out, (1, 0, 2))[:B, :t_max]                # (B, t_max, 2H) batch_first
    h = jnp.concatenate([hf[0], hf[1]], axis=-1)[:B]                   # cat(h[-2], h[-1]) -> (B, 2H)
    return y_out, jnp.asarray(lens_np), h


# ------------------------------------------------------------- reference -----

def _ref_direction(x_tbd, lens, w_ih, w_hh, b, reverse):
    T, B, D = x_tbd.shape
    H = w_hh.shape[0]

    def step(carry, inp):
        h, c = carry
        x_t, t = inp
        gates = x_t @ w_ih + h @ w_hh + b
        i = jax.nn.sigmoid(gates[:, :H])
        f = jax.nn.sigmoid(gates[:, H:2 * H])
        g = jnp.tanh(gates[:, 2 * H:3 * H])
        o = jax.nn.sigmoid(gates[:, 3 * H:])
        c_new = f * c + i * g
        h_new = o * jnp.tanh(c_new)
        valid = (t < lens)[:, None]
        return ((jnp.where(valid, h_new, h), jnp.where(valid, c_new, c)),
                jnp.where(valid, h_new, 0.0))

    ts = jnp.arange(T)
    xs = x_tbd
    if reverse:
        ts, xs = ts[::-1], xs[::-1]
    (h, _), ys = jax.lax.scan(step,
                              (jnp.zeros((B, H), jnp.float32),
                               jnp.zeros((B, H), jnp.float32)),
                              (xs, ts))
    if reverse:
        ys = ys[::-1]
    return ys, h


def rnn_default_reference(params, x_btd, lens):
    lens_np = np.asarray(lens, np.int32)
    t_max = int(lens_np.max())
    lens_dev = jnp.asarray(lens_np)
    B, T, D = x_btd.shape
    x_tbd = jnp.transpose(x_btd, (1, 0, 2)).astype(jnp.float32)
    y_f, h_f = _ref_direction(x_tbd, lens_dev, params["w_ih_f"], params["w_hh_f"],
                              params["b_f"], reverse=False)
    y_r, h_r = _ref_direction(x_tbd, lens_dev, params["w_ih_r"], params["w_hh_r"],
                              params["b_r"], reverse=True)
    y = jnp.concatenate([y_f, y_r], axis=-1)
    y = jnp.transpose(y, (1, 0, 2))[:, :t_max, :]
    h = jnp.concatenate([h_f, h_r], axis=-1)
    return y, lens_dev, h


# ------------------------------------------------------------------ main -----

if __name__ == "__main__":
    B, T, D, H = 2, 8, 16, 32
    key = jax.random.PRNGKey(0)
    k_p, k_x = jax.random.split(key)

    params = init_params(k_p, input_size=D, hidden_size=H)
    x = jax.random.normal(k_x, (B, T, D), jnp.float32)
    lens = np.array([8, 5], np.int32)              # host-side valid lengths

    y, out_lens, h = rnn_default_forward(params, x, lens)
    jax.block_until_ready((y, out_lens, h))

    y_ref, _, h_ref = rnn_default_reference(params, x, lens)
    assert y.shape == (B, int(lens.max()), 2 * H)
    assert h.shape == (B, 2 * H)
    assert jnp.allclose(y, y_ref, atol=2e-4, rtol=2e-4), float(jnp.abs(y - y_ref).max())
    assert jnp.allclose(h, h_ref, atol=2e-4, rtol=2e-4), float(jnp.abs(h - h_ref).max())

    print("KERNEL_OK")
</pallas_src>

<mosaic_0001>
module attributes {stable_mosaic.version = 11 : i64} {
  func.func @_bilstm_kernel(%arg0: i32, %arg1: memref<8x8x1xf32, #tpu.memory_space<vmem>>, %arg2: memref<1x8x8x128xf32, #tpu.memory_space<vmem>>, %arg3: memref<1x32x128xf32, #tpu.memory_space<vmem>>, %arg4: memref<1x8x8x32xf32, #tpu.memory_space<vmem>>, %arg5: memref<1x8x32xf32, #tpu.memory_space<vmem>>) attributes {dimension_semantics = [#tpu.dimension_semantics<parallel>], iteration_bounds = array<i64: 2>, scalar_prefetch = 0 : i64, scratch_operands = 0 : i64, tpu.core_type = #tpu.core_type<tc>, window_params = [{pipeline_mode = #tpu.pipeline_mode<synchronous>, transform_indices = @transform_0, window_bounds = array<i64: 8, 8, 1>}, {transform_indices = @transform_1, window_bounds = array<i64: 1, 8, 8, 128>}, {transform_indices = @transform_2, window_bounds = array<i64: 1, 32, 128>}, {transform_indices = @transform_3, window_bounds = array<i64: 1, 8, 8, 32>}, {transform_indices = @transform_4, window_bounds = array<i64: 1, 8, 32>}]} {
    %c0 = arith.constant 0 : index
    %c0_0 = arith.constant 0 : index
    %c0_1 = arith.constant 0 : index
    %0 = vector.load %arg3[%c0, %c0_0, %c0_1] : memref<1x32x128xf32, #tpu.memory_space<vmem>>, vector<1x32x128xf32>
    %1 = vector.shape_cast %0 : vector<1x32x128xf32> to vector<32x128xf32>
    %cst = arith.constant 0.000000e+00 : f32
    %2 = vector.broadcast %cst : f32 to vector<8x32xf32>
    %cst_2 = arith.constant 0.000000e+00 : f32
    %3 = vector.broadcast %cst_2 : f32 to vector<8x32xf32>
    %c0_i32 = arith.constant 0 : i32
    %c8_i32 = arith.constant 8 : i32
    %4 = arith.addi %c0_i32, %c8_i32 : i32
    %c1_i32 = arith.constant 1 : i32
    %5:2 = scf.for %arg6 = %c0_i32 to %4 step %c1_i32 iter_args(%arg7 = %2, %arg8 = %3) -> (vector<8x32xf32>, vector<8x32xf32>)  : i32 {
      %c0_i32_7 = arith.constant 0 : i32
      %9 = arith.cmpi eq, %arg0, %c0_i32_7 : i32
      %c7_i32 = arith.constant 7 : i32
      %10 = arith.subi %c7_i32, %arg6 : i32
      %11 = arith.select %9, %arg6, %10 : i32
      %c0_8 = arith.constant 0 : index
      %12 = arith.index_cast %11 : i32 to index
      %c0_9 = arith.constant 0 : index
      %c0_10 = arith.constant 0 : index
      %13 = vector.load %arg2[%c0_8, %12, %c0_9, %c0_10] : memref<1x8x8x128xf32, #tpu.memory_space<vmem>>, vector<1x1x8x128xf32>
      %14 = vector.shape_cast %13 : vector<1x1x8x128xf32> to vector<1x8x128xf32>
      %15 = vector.shape_cast %14 : vector<1x8x128xf32> to vector<8x128xf32>
      %16 = arith.index_cast %11 : i32 to index
      %c0_11 = arith.constant 0 : index
      %c0_12 = arith.constant 0 : index
      %17 = vector.load %arg1[%16, %c0_11, %c0_12] : memref<8x8x1xf32, #tpu.memory_space<vmem>>, vector<1x8x1xf32>
      %18 = vector.shape_cast %17 : vector<1x8x1xf32> to vector<8x1xf32>
      %cst_13 = arith.constant dense<0.000000e+00> : vector<8x128xf32>
      %19 = tpu.matmul %arg7, %1, %cst_13 {dimension_numbers = #tpu.dot_dimension_numbers<[1], [0], [0], [1], [0, 0, 1, 1], [], []>} : vector<8x32xf32>, vector<32x128xf32>, vector<8x128xf32> -> vector<8x128xf32>
      %20 = arith.addf %15, %19 : vector<8x128xf32>
      %21 = vector.extract_strided_slice %20 {offsets = [0, 0], sizes = [8, 32], strides = [1, 1]} : vector<8x128xf32> to vector<8x32xf32>
      %22 = arith.negf %21 : vector<8x32xf32>
      %23 = math.exp %22 : vector<8x32xf32>
      %cst_14 = arith.constant 1.000000e+00 : f32
      %24 = vector.broadcast %cst_14 : f32 to vector<8x32xf32>
      %25 = arith.addf %24, %23 : vector<8x32xf32>
      %26 = arith.divf %24, %25 : vector<8x32xf32>
      %27 = vector.extract_strided_slice %20 {offsets = [0, 32], sizes = [8, 32], strides = [1, 1]} : vector<8x128xf32> to vector<8x32xf32>
      %28 = arith.negf %27 : vector<8x32xf32>
      %29 = math.exp %28 : vector<8x32xf32>
      %cst_15 = arith.constant 1.000000e+00 : f32
      %30 = vector.broadcast %cst_15 : f32 to vector<8x32xf32>
      %31 = arith.addf %30, %29 : vector<8x32xf32>
      %32 = arith.divf %30, %31 : vector<8x32xf32>
      %33 = vector.extract_strided_slice %20 {offsets = [0, 64], sizes = [8, 32], strides = [1, 1]} : vector<8x128xf32> to vector<8x32xf32>
      %34 = math.tanh %33 : vector<8x32xf32>
      %35 = vector.extract_strided_slice %20 {offsets = [0, 96], sizes = [8, 32], strides = [1, 1]} : vector<8x128xf32> to vector<8x32xf32>
      %36 = arith.negf %35 : vector<8x32xf32>
      %37 = math.exp %36 : vector<8x32xf32>
      %cst_16 = arith.constant 1.000000e+00 : f32
      %38 = vector.broadcast %cst_16 : f32 to vector<8x32xf32>
      %39 = arith.addf %38, %37 : vector<8x32xf32>
      %40 = arith.divf %38, %39 : vector<8x32xf32>
      %41 = arith.mulf %32, %arg8 : vector<8x32xf32>
      %42 = arith.mulf %26, %34 : vector<8x32xf32>
      %43 = arith.addf %41, %42 : vector<8x32xf32>
      %44 = math.tanh %43 : vector<8x32xf32>
      %45 = arith.mulf %40, %44 : vector<8x32xf32>
      %46 = vector.broadcast %18 : vector<8x1xf32> to vector<8x32xf32>
      %47 = arith.mulf %46, %45 : vector<8x32xf32>
      %cst_17 = arith.constant 1.000000e+00 : f32
      %48 = vector.broadcast %cst_17 : f32 to vector<8x1xf32>
      %49 = arith.subf %48, %18 : vector<8x1xf32>
      %50 = vector.broadcast %49 : vector<8x1xf32> to vector<8x32xf32>
      %51 = arith.mulf %50, %arg7 : vector<8x32xf32>
      %52 = arith.addf %47, %51 : vector<8x32xf32>
      %53 = vector.broadcast %18 : vector<8x1xf32> to vector<8x32xf32>
      %54 = arith.mulf %53, %43 : vector<8x32xf32>
      %cst_18 = arith.constant 1.000000e+00 : f32
      %55 = vector.broadcast %cst_18 : f32 to vector<8x1xf32>
      %56 = arith.subf %55, %18 : vector<8x1xf32>
      %57 = vector.broadcast %56 : vector<8x1xf32> to vector<8x32xf32>
      %58 = arith.mulf %57, %arg8 : vector<8x32xf32>
      %59 = arith.addf %54, %58 : vector<8x32xf32>
      %60 = vector.broadcast %18 : vector<8x1xf32> to vector<8x32xf32>
      %61 = arith.mulf %60, %45 : vector<8x32xf32>
      %62 = vector.shape_cast %61 : vector<8x32xf32> to vector<1x8x32xf32>
      %c0_19 = arith.constant 0 : index
      %63 = arith.index_cast %11 : i32 to index
      %c0_20 = arith.constant 0 : index
      %c0_21 = arith.constant 0 : index
      %64 = vector.load %arg4[%c0_19, %63, %c0_20, %c0_21] : memref<1x8x8x32xf32, #tpu.memory_space<vmem>>, vector<1x1x8x32xf32>
      %65 = vector.shape_cast %64 : vector<1x1x8x32xf32> to vector<1x8x32xf32>
      %66 = vector.shape_cast %62 : vector<1x8x32xf32> to vector<1x1x8x32xf32>
      tpu.vector_store %arg4[%c0_19, %63, %c0_20, %c0_21], %66 {strides = array<i32>} : memref<1x8x8x32xf32, #tpu.memory_space<vmem>>, vector<1x1x8x32xf32>,
      scf.yield %52, %59 : vector<8x32xf32>, vector<8x32xf32>
    }
    %c8_i32_3 = arith.constant 8 : i32
    %c0_4 = arith.constant 0 : index
    %c0_5 = arith.constant 0 : index
    %c0_6 = arith.constant 0 : index
    %6 = vector.load %arg5[%c0_4, %c0_5, %c0_6] : memref<1x8x32xf32, #tpu.memory_space<vmem>>, vector<1x8x32xf32>
    %7 = vector.shape_cast %6 : vector<1x8x32xf32> to vector<8x32xf32>
    %8 = vector.shape_cast %5#0 : vector<8x32xf32> to vector<1x8x32xf32>
    tpu.vector_store %arg5[%c0_4, %c0_5, %c0_6], %8 {strides = array<i32>} : memref<1x8x32xf32, #tpu.memory_space<vmem>>, vector<1x8x32xf32>,
    return
  }
  func.func @transform_0(%arg0: i32) -> (i32, i32, i32) {
    %c0_i32 = arith.constant 0 : i32
    %c0_i32_0 = arith.constant 0 : i32
    %c0_i32_1 = arith.constant 0 : i32
    %c0_i32_2 = arith.constant 0 : i32
    return %c0_i32, %c0_i32_0, %c0_i32_1 : i32, i32, i32
  }
  func.func @transform_1(%arg0: i32) -> (i32, i32, i32, i32) {
    %c0_i32 = arith.constant 0 : i32
    %c0_i32_0 = arith.constant 0 : i32
    %c0_i32_1 = arith.constant 0 : i32
    %c0_i32_2 = arith.constant 0 : i32
    return %arg0, %c0_i32, %c0_i32_0, %c0_i32_1 : i32, i32, i32, i32
  }
  func.func @transform_2(%arg0: i32) -> (i32, i32, i32) {
    %c0_i32 = arith.constant 0 : i32
    %c0_i32_0 = arith.constant 0 : i32
    %c0_i32_1 = arith.constant 0 : i32
    return %arg0, %c0_i32, %c0_i32_0 : i32, i32, i32
  }
  func.func @transform_3(%arg0: i32) -> (i32, i32, i32, i32) {
    %c0_i32 = arith.constant 0 : i32
    %c0_i32_0 = arith.constant 0 : i32
    %c0_i32_1 = arith.constant 0 : i32
    %c0_i32_2 = arith.constant 0 : i32
    return %arg0, %c0_i32, %c0_i32_0, %c0_i32_1 : i32, i32, i32, i32
  }
  func.func @transform_4(%arg0: i32) -> (i32, i32, i32) {
    %c0_i32 = arith.constant 0 : i32
    %c0_i32_0 = arith.constant 0 : i32
    %c0_i32_1 = arith.constant 0 : i32
    return %arg0, %c0_i32, %c0_i32_0 : i32, i32, i32
  }
}

</mosaic_0001>

<bundles_post_ra>
// kernel: tpu_custom_call.1
= control target key start
LH: loop header
LB: loop body
LE: loop exit
PB: predicated region body
PF: predicated region fallthrough
CT: control target
= control target key end

     0   :  { %10 = vsyncpa [#allocation3], 0  ;;  %s1129_s0 = inlined_call_operand.vmem [shape: f32[8,8,1], index: 0, kind: input, shape index: {}]   ;;  %s1130_s1 = inlined_call_operand.hbm [shape: f32[2,8,8,128], index: 1, kind: input, shape index: {}]   ;;  %s1131_s2 = inlined_call_operand.vmem [shape: f32[2,32,128], index: 2, kind: input, shape index: {}]   ;;  %s1132_s3 = inlined_call_operand.hbm [shape: f32[2,8,8,32], index: 3, kind: output, shape index: {0}]   ;;  %s1133_s4 = inlined_call_operand.hbm [shape: f32[2,8,32], index: 4, kind: output, shape index: {1}]  }
   0x1   :  { %12 = vsyncpa [#allocation3 + $0x1], 0 }
   0x2   :  { %13 = vsyncpa [#allocation4], 0 }
   0x3   :  { %15 = vsyncpa [#allocation4 + $0x1], 0 }
   0x4   :  { %16 = vsyncpa [#allocation7], 0 }
   0x5   :  { %18 = vsyncpa [#allocation7 + $0x1], 0  ;;  %s885_s15 = smov 0   ;;  %s887_s16 = smov 0  }
   0x6   :  { %s889_s17 = smov 0   ;;  %s891_s18 = smov 0  }
   0x7 LB: > { %s906_s19 = sadd.s32 4294967295, %s833_s18   ;;  %s563_s20 = sadd.s32 4294967294, %s833_s18   ;;  %s833_s18 = sphi %s891_s18, %s1151_s18   ;;  %s829_s17 = sphi %s889_s17, %s1150_s17   ;;  %s825_s16 = sphi %s887_s16, %s1149_s16   ;;  %s821_s15 = sphi %s885_s15, %s1148_s15  }
   0x8   : > { %s910_s21 = sadd.s32 1, %s833_s18   ;;  %s52_s22 = sadd.s32 1, %s829_s17 }
   0x9   : > { %s49_s23 = ssub.s32 %s833_s18, %s910_s21  ;;  %p59_p0 = scmp.ne.s32.totalorder %s829_s17, %s825_s16 }
   0xa   : > { %p50_p1 = scmp.eq.s32.totalorder %s49_s23, 0  ;;  %p60_p2 = scmp.eq.s32.totalorder %s833_s18, 0 }
   0xb   : > { %p65_p3 = scmp.ne.s32.totalorder %s825_s16, %s821_s15  ;;  %p1134_p4 = scmp.eq.s32.totalorder %s906_s19, 0 }
   0xc   : > { %s922_s24 = scalar_select %p50_p1, %s829_s17, %s52_s22  }
   0xd   : > { %p924_p5 = por %p60_p2, %p59_p0  ;;  %p930_p6 = por %p1134_p4, %p65_p3 }
   0xe   : > { %p115_p7 = scmp.eq.s32.totalorder %s906_s19, 1  ;;  %p121_p8 = scmp.eq.s32.totalorder %s563_s20, 1 }
   0xf   : > { %s1138_s26 = scalar_select %p930_p6, 1, 0 }
  0x10   : > { %p621_p10 = scmp.lt.s32.totalorder %s833_s18, 2  ;;  %p937_p11 = por %p115_p7, %p59_p0 }
  0x11   : > { %p941_p12 = por %p121_p8, %p65_p3  ;;  %s170_s29 = sand.u32 1, %s829_s17  }
  0x12   : > { %s1139_s27 = scalar_select %p937_p11, 1, 0 }
  0x13   : > { %s1140_s28 = scalar_select %p941_p12, 1, 0 }
  0x14   : > { %s585_s30 = sshll.u32 %s833_s18, 10  ;;  %s566_s5 = sshll.u32 %s170_s29, 6 }
  0x15   : > { %s950_s8 = scalar_lea.hbm %s1130_s1, %s585_s30  ;;  %s174_s9 = scalar_lea.vmem [#allocation2], %s566_s5 }
  0x16   : > { %s181_s10 = sshll.u32 %s174_s9, 4  ;;  %p954_p13 = pnand %p621_p10, %p924_p5  ;;  %s958_s10 = int_to_ptr.vmem [resolvable:$true] %s181_s10 }
  0x17   : > { %s960_s12 = scalar_lea.sflag [#allocation3], %s170_s29  ;;  %s699_s13 = scalar_lea.hbm %s950_s8, 1024 }
  0x18   : > { %p700_p0 = scmp.ne.s32.totalorder %s950_s8, %s699_s13  ;;  %p701_p1 = pneg %p954_p13 }
  0x19   : > { %s704_s22 = scalar_lea.hbm %s1130_s1, 2048  ;;  %p705_p5 = scmp.lt.s32.totalorder %s950_s8, %s1130_s1 }
  0x1a   : > { %p702_p2 = pnand %p701_p1, %p700_p0  ;;  %p706_p7 = scmp.lt.s32.totalorder %s704_s22, %s699_s13 }
  0x1c   : > { %p703_p3 = pneg %p702_p2  ;;  %p707_p8 = por %p706_p7, %p705_p5 }
  0x1e   : > { %p708_p10 = pnand %p707_p8, %p703_p3 }
  0x20   : > { %711 = shalt.err (!%p708_p10)
}
  0x21   : > { %s712_s29 = scalar_lea.vmem %s958_s10, 1024  ;;  %s847_s30 = smov [#allocation2]  }
  0x22   : > { %p713_p9 = scmp.ne.s32.totalorder %s958_s10, %s712_s29  ;;  %s717_s5 = sshll.u32 %s847_s30, 4  ;;  %s718_s5 = int_to_ptr.vmem [resolvable:$false] %s717_s5 }
  0x23   : > { %s719_s6 = scalar_lea.vmem %s718_s5, 2048  ;;  %p720_p2 = scmp.lt.s32.totalorder %s958_s10, %s718_s5 }
  0x24   : > { %p715_p4 = pnand %p713_p9, %p701_p1  ;;  %p721_p12 = scmp.lt.s32.totalorder %s719_s6, %s712_s29 }
  0x26   : > { %p716_p0 = pneg %p715_p4  ;;  %p722_p11 = por %p721_p12, %p720_p2 }
  0x28   : > { %p723_p6 = pnand %p722_p11, %p716_p0 }
  0x2a   : > { %726 = shalt.err (!%p723_p6)
}
  0x2b   : > { %s848_s7 = smov 128   ;;  %s849_s9 = smov 8  }
  0x2c   : > { %613 = dma.hbm_to_vmem [thread:$0]  (!%p954_p13), %s950_s8, 1024, %s958_s10, %s960_s12, %s848_s7, %s848_s7, %s849_s9  }
  0x2d   : > { %p569_p4 = scmp.ge.s32.totalorder %s833_s18, 1  ;;  %p197_p9 = scmp.lt.s32.totalorder %s833_s18, 3 }
  0x2f   : > { %p198_p1 = pnand %p569_p4, %p197_p9 }
  0x30   : > { %s984_s13 = sand.u32 (!%p198_p1), 1, %s825_s16   ;;  %p1142_p6 = scmp.ne.s32.totalorder (!%p198_p1), %s1138_s26, 0 }
  0x31   : > { %201 = sbr.rel (%p198_p1) target bundleno = 908 (0x38c), region = 32  ;;  %s570_s14 = sshll.u32 (!%p198_p1), %s984_s13, 6 }
  0x32   : > { %s204_s20 = scalar_lea.sflag (!%p198_p1), [#allocation3], %s984_s13  ;;  %s988_s22 = scalar_lea.vmem (!%p198_p1), [#allocation2], %s570_s14 }
  0x36   : > { %808 = dma.done.wait (%p1142_p6), %s204_s20, 1024  }
  0x37   : > { %810 = vsyncadd (%p1142_p6), %s204_s20, 4294966272  ;;  %p242_p11 = scmp.lt.s32.totalorder %s906_s19, 1  ;;  %s572_s8 = sshll.u32 %s984_s13, 3  ;;  %v1012_v4 = vmov 0.0   ;;  %v1014_v5 = vmov 0.0  }
  0x38   : > { %s1008_s26 = scalar_lea.vmem [#allocation5], %s570_s14  ;;  %s1010_s29 = scalar_lea.vmem [#allocation6], %s572_s8 }
  0x39   : > { %s243_s10 = scalar_select %p242_p11, %s906_s19, 1 }
  0x3a   : > { %s1016_s30 = smov 0  }
  0x3b   : > { %s586_s11 = sshll.u32 %s243_s10, 5 }
  0x3c   : > { %s246_s25 = scalar_lea.vmem %s1131_s2, %s586_s11 }
  0x3d   : > { %v1000_v0 = vld [vmem:[%s246_s25] sm:$0xff]  ;;  %v1002_v1 = vld [vmem:[%s246_s25 + $0x8] sm:$0xff]  ;;  %v1004_v2 = vld [vmem:[%s246_s25 + $0x10] sm:$0xff] }
  0x3e   : > { %v1006_v3 = vld [vmem:[%s246_s25 + $0x18] sm:$0xff] }
  0x3f LB: >> { %v850_v6 = vmov 0.0   ;;  %vm851_vm0 = vmmov 0   ;;  %s852_s5 = smov 32   ;;  %vm270_vm1 = vcmask 261120   ;;  %s260_s6 = ssub.s32 7, %s845_s30  ;;  %v853_v12 = vmov 0   ;;  %s845_s30 = sphi %s1016_s30, %s256_s30   ;;  %v841_v5 = vphi %v1014_v5, %v1144_v5   ;;  %v837_v4 = vphi %v1012_v4, %v384_v4  }
  0x40   : >> { %593 = vmatprep.subr.mxu0 %v850_v6  ;;  %601 = vmatprep.mubr.msk.f32.mxu0 %vm851_vm0, %v850_v6  ;;  %p1143_p12 = scmp.eq.s32.totalorder %s906_s19, 0  ;;  %s854_s20 = smov 64  }
  0x41   : >> { %268 = vrot.lane.b32.xlu0 %v841_v5, %s852_s5  ;;  %594 = vmatpush3.msra.mxu0 %v1006_v3 }
  0x42   : >> { %595 = vmatprep.subr.mxu0 %v850_v6  ;;  %s261_s7 = scalar_select %p1143_p12, %s845_s30, %s260_s6  ;;  %689 = vset.pattern.permute.xlu1 %v853_v12 }
  0x43   : >> { %596 = vmatpush3.msra.mxu0 %v1004_v2  ;;  %690 = vset.pattern.permute.xlu0 %v853_v12  ;;  %s256_s30 = sadd.s32 1, %s845_s30  }
  0x44   : >> { %597 = vmatprep.subr.mxu0 %v850_v6  ;;  %s1033_s9 = sshll.u32 %s261_s7, 3  ;;  %p253_p13 = scmp.ge.s32.totalorder %s256_s30, 8  }
  0x45   : >> { %598 = vmatpush3.msra.mxu0 %v1002_v1  ;;  %s263_s14 = scalar_lea.vmem %s988_s22, %s1033_s9 [#allocation2]  ;;  %s265_s11 = scalar_lea.vmem %s1129_s0, %s1033_s9 }
  0x46   : >> { %599 = vmatprep.subr.mxu0 %v850_v6  ;;  %v264_v8 = vld [vmem:[%s263_s14] sm:$0xff]  ;;  %s389_s12 = scalar_lea.vmem %s1008_s26, %s1033_s9 [#allocation5]  ;;  %s855_s23 = smov (%p253_p13), 32  }
  0x47   : >> { %600 = vmatpush3.msra.mxu0 %v1000_v0  ;;  %v266_v20 = vld [vmem:[%s265_s11] sm:$0xff]  ;;  %s587_s25 = sshll.u32 (%p253_p13), %s906_s19, 10  ;;  %s398_s30 = scalar_lea.sflag (%p253_p13), [#allocation4], %s984_s13 }
  0x48   : >> { %v374_v21 = vsub.f32 1.0, %v266_v20  ;;  %s1058_s9 = scalar_lea.hbm (%p253_p13), %s1132_s3, %s587_s25  ;;  %p1145_p5 = scmp.ne.s32.totalorder (%p253_p13), %s1139_s27, 0 }
  0x49   : > { %s856_s22 = smov (%p253_p13), [#allocation5]  }
  0xb3   : >> { %v269_v7 = vpop.permute.xlu0 %268 }
  0xb4   : >> { %602 = vmatmul.mubr.msk.f32.vlgmr.msra.gmra.mxu0 %vm270_vm1, %v269_v7 }
 0x174   : >> { %v339_v9 = vpop.f32.mrf.mxu0 }
 0x175   : >> { %v343_v10 = vadd.f32 %v339_v9, %v264_v8 }
 0x176   : >> { %v603_v11 = vpop.f32.mrf.mxu0 }
 0x177   : >> { %691 = vtanh.f32 %v343_v10  ;;  %v577_v14 = vmul.f32 -1.442695, %v343_v10 }
 0x179   : >> { %693 = vpow2.f32 %v577_v14 }
 0x184   : >> { %v692_v13 = vpop.eup %691 }
 0x185   : >> { %353 = vrot.lane.b32.xlu0 %v692_v13, %s854_s20 }
 0x186   : >> { %v694_v15 = vpop.eup %693 }
 0x187   : >> { %v347_v16 = vadd.f32 1.0, %v694_v15 }
 0x189   : >> { %695 = vrcp.f32 %v347_v16 }
 0x196   : >> { %v696_v17 = vpop.eup %695 }
 0x197   : >> { %v351_v22 = vmul.f32 %v837_v4, %v696_v17 }
 0x1f7   : >> { %v354_v18 = vpop.permute.xlu0 %353 }
 0x1f8   : >> { %v356_v19 = vmul.f32 %v696_v17, %v354_v18 }
 0x1fa   : >> { %358 = vrot.lane.b32.xlu1 %v356_v19, %s852_s5 }
 0x1fe   : >> { %370 = vperm.xlu1 %689, %v266_v20  }
 0x202   : >> { %377 = vperm.xlu1 %689, %v374_v21  }
 0x26c   : >> { %v359_v23 = vpop.permute.xlu1 %358 }
 0x26d   : >> { %v361_v24 = vadd.f32 %v359_v23, %v351_v22 }
 0x26f   : >> { %697 = vtanh.f32 %v361_v24 }
 0x279   : >> { %v371_v25 = vpop.permute.xlu1 %370 }
 0x27a   : >> { %v382_v28 = vmul.f32 %v371_v25, %v361_v24 }
 0x27c   : >> { %v698_v26 = vpop.eup %697 }
 0x27d   : >> { %v378_v27 = vpop.permute.xlu1 %377  ;;  %364 = vrot.lane.b32.xlu0 %v698_v26, %s854_s20  ;;  %s731_s20 = sshll.u32 (%p253_p13), %s856_s22, 4  ;;  %s732_s20 = int_to_ptr.vmem [resolvable:$false] %s731_s20 }
 0x27e   : >> { %v383_v29 = vmul.f32 %v837_v4, %v378_v27  ;;  %v380_v31 = vmul.f32 %v841_v5, %v378_v27 }
 0x280   : >> { %v384_v4 = vadd.f32 %v383_v29, %v382_v28  }
 0x2ef   : >> { %v365_v30 = vpop.permute.xlu0 %364 }
 0x2f0   : >> { %v367_v32 = vmul.f32 %v696_v17, %v365_v30 }
 0x2f2   : >> { %v373_v33 = vmul.f32 %v371_v25, %v367_v32 }
 0x2f4   : >> { %v381_v34 = vadd.f32 %v380_v31, %v373_v33   ;;  %386 = vrot.lane.b32.xlu0 %v373_v33, %s852_s5  ;;  %s416_s5 = sshll.u32 (%p253_p13), %s1008_s26, 4  ;;  %s733_s26 = scalar_lea.vmem (%p253_p13), %s732_s20, 2048  ;;  %s1060_s5 = int_to_ptr.vmem [resolvable:$true] %s416_s5 }
 0x2f5   : > { %s727_s14 = scalar_lea.vmem (%p253_p13), %s1060_s5, 1024  ;;  %p734_p10 = scmp.lt.s32.totalorder (%p253_p13), %s1060_s5, %s732_s20 }
 0x2f6   : >> { %v1144_v5 = vmov %v381_v34  ;;  %p728_p3 = scmp.ne.s32.totalorder (%p253_p13), %s1060_s5, %s727_s14  ;;  %p735_p0 = scmp.lt.s32.totalorder (%p253_p13), %s733_s26, %s727_s14 }
 0x2f8   : > { %392 = vrot.lane.b32.xlu0 (%p253_p13), %v381_v34, %s855_s23  ;;  %p729_p7 = pnand (%p253_p13), %p728_p3, %p1145_p5  ;;  %p736_p2 = por (%p253_p13), %p735_p0, %p734_p10 }
 0x2fa   : > { %p730_p8 = pneg (%p253_p13), %p729_p7 }
 0x2fc   : > { %p737_p4 = pnand (%p253_p13), %p736_p2, %p730_p8 }
 0x363   : > { %255 = sbr.rel (!%p253_p13) target bundleno = 63 (0x3f), region = 107 }
 0x366   : >> { %v387_v35 = vpop.permute.xlu0 %386 }
 0x367   : >> { %390 = vst.msk [vmem:[%s389_s12] sm:$0xff] %vm270_vm1, %v387_v35 }
 0x368   : > { %740 = shalt.err (!%p737_p4)
}
 0x369   : > { %s741_s8 = scalar_lea.hbm %s1058_s9, 1024  ;;  %s745_s12 = scalar_lea.hbm %s1132_s3, 2048 }
 0x36a   : > { %p742_p9 = scmp.ne.s32.totalorder %s1058_s9, %s741_s8  ;;  %p746_p11 = scmp.lt.s32.totalorder %s1058_s9, %s1132_s3 }
 0x36b   : > { %p747_p12 = scmp.lt.s32.totalorder %s745_s12, %s741_s8 }
 0x36c   : > { %p743_p1 = pnand %p742_p9, %p1145_p5 }
 0x36d   : > { %p748_p13 = por %p747_p12, %p746_p11 }
 0x36e   : > { %p744_p6 = pneg %p743_p1 }
 0x370   : > { %p749_p3 = pnand %p748_p13, %p744_p6 }
 0x372   : > { %752 = shalt.err (!%p749_p3)
}
 0x373   : > { %s857_s6 = smov 128   ;;  %s858_s7 = smov 8   ;;  %v393_v36 = vpop.permute.xlu0 %392 }
 0x374   : > { %606 = dma.vmem_to_hbm [thread:$0]  (%p1145_p5), %s1060_s5, 1024, %s1058_s9, %s398_s30, %s857_s6, %s857_s6, %s858_s7  }
 0x375   : > { %s582_s14 = sshll.u32 %s906_s19, 7  ;;  %s432_s22 = sshll.u32 %s1010_s29, 4  ;;  %396 = vst.msk [vmem:[%s1010_s29] sm:$0xff] %vm270_vm1, %v393_v36  ;;  %s433_s22 = int_to_ptr.vmem [resolvable:$true] %s432_s22 }
 0x376   : > { %s1090_s8 = scalar_lea.hbm %s1133_s4, %s582_s14  ;;  %s403_s10 = scalar_lea.sflag [#allocation7], %s984_s13 }
 0x377   : > { %s753_s11 = scalar_lea.vmem %s433_s22, 128  ;;  %s859_s12 = smov [#allocation6]  }
 0x378   : > { %p754_p7 = scmp.ne.s32.totalorder %s433_s22, %s753_s11  ;;  %s757_s23 = sshll.u32 %s859_s12, 4  ;;  %s758_s23 = int_to_ptr.vmem [resolvable:$false] %s757_s23 }
 0x379   : > { %s759_s19 = scalar_lea.vmem %s758_s23, 256  ;;  %p760_p0 = scmp.lt.s32.totalorder %s433_s22, %s758_s23 }
 0x37a   : > { %p755_p8 = pnand %p754_p7, %p1145_p5  ;;  %p761_p2 = scmp.lt.s32.totalorder %s759_s19, %s753_s11 }
 0x37c   : > { %p756_p10 = pneg %p755_p8  ;;  %p762_p4 = por %p761_p2, %p760_p0 }
 0x37e   : > { %p763_p9 = pnand %p762_p4, %p756_p10 }
 0x380   : > { %766 = shalt.err (!%p763_p9)
}
 0x381   : > { %s767_s29 = scalar_lea.hbm %s1090_s8, 128  ;;  %s771_s9 = scalar_lea.hbm %s1133_s4, 256 }
 0x382   : > { %p768_p1 = scmp.ne.s32.totalorder %s1090_s8, %s767_s29  ;;  %p772_p12 = scmp.lt.s32.totalorder %s1090_s8, %s1133_s4 }
 0x383   : > { %p773_p13 = scmp.lt.s32.totalorder %s771_s9, %s767_s29 }
 0x384   : > { %p769_p6 = pnand %p768_p1, %p1145_p5 }
 0x385   : > { %p774_p3 = por %p773_p13, %p772_p12 }
 0x386   : > { %p770_p11 = pneg %p769_p6 }
 0x388   : > { %p775_p7 = pnand %p774_p3, %p770_p11 }
 0x38a   : > { %778 = shalt.err (!%p775_p7)
}
 0x38b   : > { %607 = dma.vmem_to_hbm [thread:$0]  (%p1145_p5), %s433_s22, 128, %s1090_s8, %s403_s10  }
 0x38c PF: > { %s444_s6 = sand.u32 1, %s821_s15   ;;  %p1146_p8 = scmp.ne.s32.totalorder %s1140_s28, 0 }
 0x38d   : > { %p1147_p10 = scmp.ge.s32.totalorder %s833_s18, 2  ;;  %s445_s7 = scalar_lea.sflag [#allocation4], %s444_s6 }
 0x38f   : > { %p615_p0 = pnand %p1147_p10, %p1146_p8 }
 0x391   : > { %p616_p2 = pneg %p615_p0 }
 0x393   : > { %812 = dma.done.wait (%p616_p2), %s445_s7, 1024  }
 0x394   : > { %814 = vsyncadd (%p616_p2), %s445_s7, 4294966272  ;;  %s454_s14 = scalar_lea.sflag [#allocation7], %s444_s6 }
 0x395   : > { %816 = dma.done.wait (%p616_p2), %s454_s14, 128  }
 0x396   : > { %818 = vsyncadd (%p616_p2), %s454_s14, 4294967168  ;;  %p21_p5 = scmp.ge.s32.totalorder %s910_s21, 4   ;;  %s1148_s15 = smov %s825_s16 }
 0x397   : > { %s1149_s16 = smov %s829_s17  ;;  %s1150_s17 = smov %s922_s24 }
 0x398   : > { %s1151_s18 = smov %s910_s21  ;;  %23 = sbr.rel (!%p21_p5) target bundleno = 7 (0x7), region = 118 }
 0x39d   :  { %459 = vsyncpa [#allocation3], 1 }
 0x39e   :  { %461 = vsyncpa [#allocation3 + $0x1], 1 }
 0x39f   :  { %462 = vsyncpa [#allocation4], 1 }
 0x3a0   :  { %464 = vsyncpa [#allocation4 + $0x1], 1 }
 0x3a1   :  { %465 = vsyncpa [#allocation7], 1 }
 0x3a2   :  { %467 = vsyncpa [#allocation7 + $0x1], 1 }

</bundles_post_ra>
